<compile_context>
chip_gen: v7x
topology: tpu7x:2x2x1
jax: 0.10.0
libtpu: 0.0.40
codegen_flags: <defaults>
</compile_context>

<pallas_src>
import functools

import jax
import jax.numpy as jnp
from jax import lax
from jax.experimental import pallas as pl
from jax.experimental.pallas import tpu as pltpu

block_size = 16
n_embd = 96

LANE = 128  # TPU vreg lane width; head dim padded to this for lane density


def head_kernel(x_ref, w_ref, o_ref, *, batch, seq, hp):
    # x_ref: (B*T, C)   -- all batch rows at once
    # w_ref: (C, 3*hp)  -- [Wk | Wq*scale | Wv], each zero-padded to hp lanes
    # o_ref: (B, T, hp)
    x = x_ref[...].astype(jnp.float32)          # (B*T, C)
    w = w_ref[...].astype(jnp.float32)          # (C, 3*hp)

    # Single fused QKV projection (one MXU op, lane-dense N = 3*128).
    qkv = jnp.dot(x, w, preferred_element_type=jnp.float32)    # (B*T, 3*hp)
    qkv = qkv.reshape(batch, seq, 3 * hp)                       # layout-preserving split

    k = qkv[:, :, :hp]             # (B, T, hp)  128-aligned lane slices
    q = qkv[:, :, hp:2 * hp]
    v = qkv[:, :, 2 * hp:]

    # Scores: contract over the (padded) head dim; zero padding contributes 0.
    # q already carries the 1/sqrt(head_size) scale (folded into Wq).
    wei = jnp.einsum('bqd,bkd->bqk', q, k,
                     preferred_element_type=jnp.float32)        # (B, T, T)

    # Causal (lower-triangular) mask with a finite large-negative value.
    row = lax.broadcasted_iota(jnp.int32, wei.shape, 1)
    col = lax.broadcasted_iota(jnp.int32, wei.shape, 2)
    wei = jnp.where(col <= row, wei, jnp.float32(-1e30))

    # Numerically stable softmax over the last dim (f32 throughout).
    wei = wei - jnp.max(wei, axis=-1, keepdims=True)
    wei = jnp.exp(wei)
    wei = wei * pl.reciprocal(jnp.sum(wei, axis=-1, keepdims=True), approx=False)

    # dropout is identity in eval mode

    out = jnp.einsum('bqk,bkd->bqd', wei, v,
                     preferred_element_type=jnp.float32)        # (B, T, hp)
    o_ref[...] = out.astype(o_ref.dtype)


@functools.partial(jax.jit, static_argnums=(4,))
def head_forward(x, w_key, w_query, w_value, head_size):
    """x: (B, T, C); weights: (C, head_size). Returns (B, T, head_size)."""
    B, T, C = x.shape
    H = head_size
    HP = LANE  # padded head dim (lane-dense)

    scale = H ** (-0.5)

    def pad_to_lane(w):
        return jnp.pad(w, ((0, 0), (0, HP - H)))

    # Fused, lane-padded QKV weight: [Wk | Wq*scale | Wv] -> (C, 3*HP)
    w_qkv = jnp.concatenate(
        [pad_to_lane(w_key), pad_to_lane(w_query * scale), pad_to_lane(w_value)],
        axis=1)

    x2d = x.reshape(B * T, C)

    kernel = functools.partial(head_kernel, batch=B, seq=T, hp=HP)
    out_padded = pl.pallas_call(
        kernel,
        out_shape=jax.ShapeDtypeStruct((B, T, HP), x.dtype),
        # No grid: total data is a few tens of KB, so everything fits in VMEM
        # for a single invocation (no software-pipeline prologue/epilogue).
        in_specs=[
            pl.BlockSpec(memory_space=pltpu.MemorySpace.VMEM),
            pl.BlockSpec(memory_space=pltpu.MemorySpace.VMEM),
        ],
        out_specs=pl.BlockSpec(memory_space=pltpu.MemorySpace.VMEM),
    )(x2d, w_qkv)

    return out_padded[..., :H]


def head_reference(x, w_key, w_query, w_value, head_size):
    """Pure-JAX reference matching the PyTorch forward (eval mode)."""
    k = x @ w_key
    q = x @ w_query
    v = x @ w_value
    wei = (q @ jnp.swapaxes(k, -2, -1)) * head_size ** (-0.5)
    T = x.shape[1]
    tril = jnp.tril(jnp.ones((T, T), dtype=bool))
    wei = jnp.where(tril, wei, -jnp.inf)
    wei = jax.nn.softmax(wei, axis=-1)
    return wei @ v


if __name__ == "__main__":
    head_size = 16
    B, T, C = 2, block_size, n_embd  # (2, 16, 96)

    key = jax.random.PRNGKey(0)
    kx, kk, kq, kv = jax.random.split(key, 4)

    x = jax.random.normal(kx, (B, T, C), dtype=jnp.float32)
    # deterministic "Linear(bias=False)" weights, stored as (in, out)
    bound = 1.0 / (C ** 0.5)
    w_key = jax.random.uniform(kk, (C, head_size), jnp.float32, -bound, bound)
    w_query = jax.random.uniform(kq, (C, head_size), jnp.float32, -bound, bound)
    w_value = jax.random.uniform(kv, (C, head_size), jnp.float32, -bound, bound)

    out = head_forward(x, w_key, w_query, w_value, head_size)
    out = jax.block_until_ready(out)

    ref = head_reference(x, w_key, w_query, w_value, head_size)
    assert out.shape == (B, T, head_size)
    assert jnp.allclose(out, ref, atol=1e-5, rtol=1e-5), "mismatch vs reference"

    print("KERNEL_OK")
</pallas_src>

<mosaic_0001>
module attributes {stable_mosaic.version = 11 : i64} {
  func.func @head_kernel(%arg0: memref<32x96xf32, #tpu.memory_space<vmem>>, %arg1: memref<96x384xf32, #tpu.memory_space<vmem>>, %arg2: memref<2x16x128xf32, #tpu.memory_space<vmem>>) attributes {dimension_semantics = [], scalar_prefetch = 0 : i64, scratch_operands = 0 : i64, tpu.core_type = #tpu.core_type<tc>} {
    %c0 = arith.constant 0 : index
    %c0_0 = arith.constant 0 : index
    %0 = vector.load %arg0[%c0, %c0_0] : memref<32x96xf32, #tpu.memory_space<vmem>>, vector<32x96xf32>
    %c0_1 = arith.constant 0 : index
    %c0_2 = arith.constant 0 : index
    %1 = vector.load %arg1[%c0_1, %c0_2] : memref<96x384xf32, #tpu.memory_space<vmem>>, vector<96x384xf32>
    %cst = arith.constant dense<0.000000e+00> : vector<32x384xf32>
    %2 = tpu.matmul %0, %1, %cst {dimension_numbers = #tpu.dot_dimension_numbers<[1], [0], [0], [1], [0, 0, 1, 1], [], []>} : vector<32x96xf32>, vector<96x384xf32>, vector<32x384xf32> -> vector<32x384xf32>
    %3 = vector.shape_cast %2 : vector<32x384xf32> to vector<2x16x384xf32>
    %4 = vector.extract_strided_slice %3 {offsets = [0, 0, 0], sizes = [2, 16, 128], strides = [1, 1, 1]} : vector<2x16x384xf32> to vector<2x16x128xf32>
    %5 = vector.extract_strided_slice %3 {offsets = [0, 0, 128], sizes = [2, 16, 128], strides = [1, 1, 1]} : vector<2x16x384xf32> to vector<2x16x128xf32>
    %6 = vector.extract_strided_slice %3 {offsets = [0, 0, 256], sizes = [2, 16, 128], strides = [1, 1, 1]} : vector<2x16x384xf32> to vector<2x16x128xf32>
    "tpu.trace_start"() <{level = 10 : i32, message = "bqd,bkd->bqk"}> : () -> ()
    %cst_3 = arith.constant dense<0.000000e+00> : vector<2x16x16xf32>
    %7 = tpu.matmul %5, %4, %cst_3 {dimension_numbers = #tpu.dot_dimension_numbers<[2], [2], [1], [1], [0, 0, 0, 1, 1, 1], [0], [0]>} : vector<2x16x128xf32>, vector<2x16x128xf32>, vector<2x16x16xf32> -> vector<2x16x16xf32>
    "tpu.trace_stop"() : () -> ()
    %8 = tpu.iota {dimensions = array<i32: 1>} : vector<2x16x16xi32>
    %9 = tpu.iota {dimensions = array<i32: 2>} : vector<2x16x16xi32>
    %10 = arith.cmpi sle, %9, %8 : vector<2x16x16xi32>
    %cst_4 = arith.constant -1.000000e+30 : f32
    %11 = vector.broadcast %cst_4 : f32 to vector<2x16x16xf32>
    %12 = arith.select %10, %7, %11 : vector<2x16x16xi1>, vector<2x16x16xf32>
    %cst_5 = arith.constant dense<0xFF800000> : vector<2x16xf32>
    %13 = vector.multi_reduction <maximumf>, %12, %cst_5 [2] : vector<2x16x16xf32> to vector<2x16xf32>
    %14 = vector.shape_cast %13 : vector<2x16xf32> to vector<2x16x1xf32>
    %15 = vector.broadcast %14 : vector<2x16x1xf32> to vector<2x16x16xf32>
    %16 = arith.subf %12, %15 : vector<2x16x16xf32>
    %17 = math.exp %16 : vector<2x16x16xf32>
    %cst_6 = arith.constant dense<0.000000e+00> : vector<2x16xf32>
    %18 = vector.multi_reduction <add>, %17, %cst_6 [2] : vector<2x16x16xf32> to vector<2x16xf32>
    %19 = vector.shape_cast %18 : vector<2x16xf32> to vector<2x16x1xf32>
    %20 = tpu.reciprocal %19 : vector<2x16x1xf32> -> vector<2x16x1xf32>
    %21 = vector.broadcast %20 : vector<2x16x1xf32> to vector<2x16x16xf32>
    %22 = arith.mulf %17, %21 : vector<2x16x16xf32>
    "tpu.trace_start"() <{level = 10 : i32, message = "bqk,bkd->bqd"}> : () -> ()
    %cst_7 = arith.constant dense<0.000000e+00> : vector<2x16x128xf32>
    %23 = tpu.matmul %22, %6, %cst_7 {dimension_numbers = #tpu.dot_dimension_numbers<[2], [1], [1], [2], [0, 0, 0, 1, 1, 2], [0], [0]>} : vector<2x16x16xf32>, vector<2x16x128xf32>, vector<2x16x128xf32> -> vector<2x16x128xf32>
    "tpu.trace_stop"() : () -> ()
    %c0_8 = arith.constant 0 : index
    %c0_9 = arith.constant 0 : index
    %c0_10 = arith.constant 0 : index
    %24 = vector.load %arg2[%c0_8, %c0_9, %c0_10] : memref<2x16x128xf32, #tpu.memory_space<vmem>>, vector<2x16x128xf32>
    tpu.vector_store %arg2[%c0_8, %c0_9, %c0_10], %23 {strides = array<i32>} : memref<2x16x128xf32, #tpu.memory_space<vmem>>, vector<2x16x128xf32>,
    return
  }
}

</mosaic_0001>

<bundles_post_ra>
// kernel: head_forward.1
= control target key start
LH: loop header
LB: loop body
LE: loop exit
PB: predicated region body
PF: predicated region fallthrough
CT: control target
= control target key end

     0   :  { %v837_v7 = vmov 0.0   ;;  %vm52_vm0 = vcmask 785408   ;;  %s1016_s0 = inlined_call_operand.vmem [shape: f32[32,96], index: 0, kind: input, shape index: {}]   ;;  %s1017_s1 = inlined_call_operand.vmem [shape: f32[96,384], index: 1, kind: input, shape index: {}]   ;;  %s1018_s2 = inlined_call_operand.hbm [shape: f32[2,16,128], index: 2, kind: output, shape index: {}]  }
   0x1   :  { %v17_v0 = vld [vmem:[%s1017_s1 + $0x8] sm:$0xff]  ;;  %v20_v1 = vld [vmem:[%s1017_s1 + $0x20] sm:$0xff]  ;;  %v19_v4 = vld [vmem:[%s1017_s1 + $0x18] sm:$0xff]  ;;  %129 = vmatprep.mubr.f32.mxu0 %v837_v7 }
   0x2   :  { %v16_v2 = vld [vmem:[%s1017_s1] sm:$0xff]  ;;  %v729_v3 = vpack.c.bf16 %v20_v1, %v17_v0  ;;  %v23_v5 = vld [vmem:[%s1017_s1 + $0x38] sm:$0xff]  ;;  %v26_v6 = vld [vmem:[%s1017_s1 + $0x50] sm:$0xff] }
   0x3   :  { %v731_v8 = vpack.c.bf16 %v19_v4, %v16_v2  ;;  %v733_v9 = vpack.c.bf16 %v26_v6, %v23_v5  ;;  %v22_v10 = vld [vmem:[%s1017_s1 + $0x30] sm:$0xff]  ;;  %v25_v11 = vld [vmem:[%s1017_s1 + $0x48] sm:$0xff]  ;;  %v32_v13 = vld [vmem:[%s1017_s1 + $0x80] sm:$0xff] }
   0x4   :  { %v29_v12 = vld [vmem:[%s1017_s1 + $0x68] sm:$0xff]  ;;  %730 = vmatprep.subr.bf16.mxu0 %v729_v3  ;;  %v735_v14 = vpack.c.bf16 %v25_v11, %v22_v10  ;;  %v28_v16 = vld [vmem:[%s1017_s1 + $0x60] sm:$0xff]  ;;  %v31_v17 = vld [vmem:[%s1017_s1 + $0x78] sm:$0xff] }
   0x5   :  { %732 = vmatpush1.bf16.msra.mxu0 %v731_v8  ;;  %v737_v15 = vpack.c.bf16 %v32_v13, %v29_v12  ;;  %v35_v18 = vld [vmem:[%s1017_s1 + $0x98] sm:$0xff]  ;;  %v38_v19 = vld [vmem:[%s1017_s1 + $0xb0] sm:$0xff]  ;;  %v739_v20 = vpack.c.bf16 %v31_v17, %v28_v16  ;;  %v37_v22 = vld [vmem:[%s1017_s1 + $0xa8] sm:$0xff] }
   0x6   :  { %734 = vmatprep.subr.bf16.mxu0 %v733_v9  ;;  %v34_v21 = vld [vmem:[%s1017_s1 + $0x90] sm:$0xff]  ;;  %v12_v23 = vld [vmem:[%s1016_s0] sm:$0xff]  ;;  %v741_v24 = vpack.c.bf16 %v38_v19, %v35_v18  ;;  %v41_v25 = vld [vmem:[%s1017_s1 + $0xc8] sm:$0xff] }
   0x7   :  { %v18_v26 = vld [vmem:[%s1017_s1 + $0x10] sm:$0xff]  ;;  %v21_v27 = vld [vmem:[%s1017_s1 + $0x28] sm:$0xff]  ;;  %695 = vmatprep.mubr.msk.f32.mxu1 %vm52_vm0, %v12_v23  ;;  %v44_v28 = vld [vmem:[%s1017_s1 + $0xe0] sm:$0xff]  ;;  %v743_v35 = vpack.c.bf16 %v37_v22, %v34_v21 }
   0x8   :  { %v753_v29 = vpack.c.bf16 %v21_v27, %v18_v26  ;;  %v24_v30 = vld [vmem:[%s1017_s1 + $0x40] sm:$0xff]  ;;  %v27_v31 = vld [vmem:[%s1017_s1 + $0x58] sm:$0xff]  ;;  %v30_v33 = vld [vmem:[%s1017_s1 + $0x70] sm:$0xff]  ;;  %v745_v36 = vpack.c.bf16 %v44_v28, %v41_v25 }
   0x9   :  { %736 = vmatpush1.bf16.msra.mxu0 %v735_v14  ;;  %v757_v32 = vpack.c.bf16 %v27_v31, %v24_v30  ;;  %v33_v34 = vld [vmem:[%s1017_s1 + $0x88] sm:$0xff]  ;;  %v40_v37 = vld [vmem:[%s1017_s1 + $0xc0] sm:$0xff]  ;;  %v43_v38 = vld [vmem:[%s1017_s1 + $0xd8] sm:$0xff] }
   0xa   :  { %738 = vmatprep.subr.bf16.mxu0 %v737_v15  ;;  %754 = vmatprep.subr.bf16.mxu1 %v753_v29 }
   0xb   :  { %756 = vmatpush3.bf16.msra.mxu1 %v753_v29 }
   0xd   :  { %740 = vmatpush1.bf16.msra.mxu0 %v739_v20 }
   0xe   :  { %742 = vmatprep.subr.bf16.mxu0 %v741_v24 }
   0xf   :  { %7 = vsyncpa [#allocation3], 0  ;;  %v47_v39 = vld [vmem:[%s1017_s1 + $0xf8] sm:$0xff]  ;;  %v50_v40 = vld [vmem:[%s1017_s1 + $0x110] sm:$0xff]  ;;  %758 = vmatprep.subr.bf16.mxu1 %v757_v32  ;;  %v761_v41 = vpack.c.bf16 %v33_v34, %v30_v33  ;;  %v747_v44 = vpack.c.bf16 %v43_v38, %v40_v37  ;;  %v389_v11 = vlaneseq  ;;  %vm400_vm2 = vcmask 130048  }
  0x10   :  { %v36_v42 = vld [vmem:[%s1017_s1 + $0xa0] sm:$0xff]  ;;  %v39_v43 = vld [vmem:[%s1017_s1 + $0xb8] sm:$0xff]  ;;  %v749_v45 = vpack.c.bf16 %v50_v40, %v47_v39  ;;  %v46_v46 = vld [vmem:[%s1017_s1 + $0xf0] sm:$0xff]  ;;  %760 = vmatpush3.bf16.msra.mxu1 %v757_v32 }
  0x11   :  { %744 = vmatpush1.bf16.msra.mxu0 %v743_v35  ;;  %v49_v47 = vld [vmem:[%s1017_s1 + $0x108] sm:$0xff]  ;;  %762 = vmatprep.subr.bf16.mxu1 %v761_v41  ;;  %v765_v48 = vpack.c.bf16 %v39_v43, %v36_v42  ;;  %v42_v49 = vld [vmem:[%s1017_s1 + $0xd0] sm:$0xff]  ;;  %v48_v53 = vld [vmem:[%s1017_s1 + $0x100] sm:$0xff]  ;;  %v390_v12 = vshrl.u32 %v389_v11, 7  ;;  %v393_v13 = vand.u32 127, %v389_v11 }
  0x12   :  { %746 = vmatprep.subr.bf16.mxu0 %v745_v36  ;;  %v45_v50 = vld [vmem:[%s1017_s1 + $0xe8] sm:$0xff]  ;;  %v751_v51 = vpack.c.bf16 %v49_v47, %v46_v46  ;;  %v51_v54 = vld [vmem:[%s1017_s1 + $0x118] sm:$0xff]  ;;  %v14_v57 = vld [vmem:[%s1016_s0 + $0x10] sm:$0xff] }
  0x13   :  { %v769_v52 = vpack.c.bf16 %v45_v50, %v42_v49  ;;  %v773_v55 = vpack.c.bf16 %v51_v54, %v48_v53  ;;  %v13_v56 = vld [vmem:[%s1016_s0 + $0x8] sm:$0xff]  ;;  %v15_v58 = vld [vmem:[%s1016_s0 + $0x18] sm:$0xff]  ;;  %v391_v14 = vadd.s32 8, %v390_v12  ;;  %vm394_vm1 = vcmp.le.s32.totalorder %v393_v13, %v390_v12  ;;  %s838_s0 = smov [#allocation2]  }
  0x14   :  { %764 = vmatpush3.bf16.msra.mxu1 %v761_v41  ;;  %s616_s4 = sshll.u32 %s838_s0, 4  ;;  %s617_s4 = int_to_ptr.vmem [resolvable:$true] %s616_s4 }
  0x15   :  { %748 = vmatpush1.bf16.msra.mxu0 %v747_v44  ;;  %766 = vmatprep.subr.bf16.mxu1 %v765_v48  ;;  %vm395_vm3 = vcmp.le.s32.totalorder %v393_v13, %v391_v14  ;;  %s813_s5 = scalar_lea.vmem %s617_s4, 512  ;;  %p818_p1 = scmp.lt.s32.totalorder %s617_s4, %s617_s4 }
  0x16   :  { %750 = vmatprep.subr.bf16.mxu0 %v749_v45  ;;  %p814_p0 = scmp.ne.s32.totalorder %s617_s4, %s813_s5  ;;  %p819_p2 = scmp.lt.s32.totalorder %s813_s5, %s813_s5 }
  0x18   :  { %768 = vmatpush3.bf16.msra.mxu1 %v765_v48  ;;  %p820_p3 = por %p819_p2, %p818_p1 }
  0x19   :  { %752 = vmatpush1.bf16.msra.mxu0 %v751_v51  ;;  %770 = vmatprep.subr.bf16.mxu1 %v769_v52 }
  0x1a   :  { %p821_p4 = pnand %p820_p3, %p814_p0 }
  0x1c   :  { %627 = vmatmul.mubr.msk.f32.vlgmr.msra.gmra.mrb[0].mxu0 %vm52_vm0, %v12_v23  ;;  %772 = vmatpush3.bf16.msra.mxu1 %v769_v52 }
  0x1d   :  { %135 = vmatprep.mubr.f32.mxu0 %v837_v7  ;;  %774 = vmatprep.subr.bf16.mxu1 %v773_v55 }
  0x20   :  { %628 = vmatmul.mubr.msk.f32.gmra.mrb[2].mxu0 %vm52_vm0, %v13_v56  ;;  %776 = vmatpush3.bf16.msra.mxu1 %v773_v55 }
  0x21   :  { %141 = vmatprep.mubr.f32.mxu0 %v837_v7 }
  0x23   :  { %696 = vmatmul.mubr.msk.f32.vlgmr.msra.gmra.mrb[0].mxu1 %vm52_vm0, %v13_v56 }
  0x24   :  { %629 = vmatmul.mubr.msk.f32.gmra.mrb[4].mxu0 %vm52_vm0, %v14_v57  ;;  %698 = vmatprep.mubr.msk.f32.mxu1 %vm52_vm0, %v14_v57 }
  0x25   :  { %147 = vmatprep.mubr.f32.mxu0 %v837_v7 }
  0x27   :  { %699 = vmatmul.mubr.msk.f32.gmra.mrb[2].mxu1 %vm52_vm0, %v15_v58 }
  0x28   :  { %630 = vmatmul.mubr.msk.f32.gmra.mrb[6].mxu0 %vm52_vm0, %v15_v58 }
  0xef   :  { %v131_v59 = vpop.f32.mrb[0].mxu0 }
  0xf0   :  { %v133_v60 = vpop.f32.mrb[1].mxu0 }
  0xf1   :  { %705 = vmatprep.mubr.f32.mxu1 %v133_v60 }
  0xf3   :  { %v137_v61 = vpop.f32.mrb[2].mxu0 }
  0xf4   :  { %v777_v62 = vpack.c.bf16 %v137_v61, %v131_v59  ;;  %v139_v63 = vpop.f32.mrb[3].mxu0 }
  0xf6   :  { %778 = vmatprep.subr.bf16.mxu1 %v777_v62  ;;  %v697_v2 = vpop.f32.mrb[0].mxu1 }
  0xf7   :  { %v143_v0 = vpop.f32.mrb[4].mxu0  ;;  %780 = vmatpush3.bf16.xpose.msra.mxu1 %v777_v62  ;;  %v220_v3 = vpop.f32.mrb[1].mxu1 }
  0xf8   :  { %v145_v1 = vpop.f32.mrb[5].mxu0  ;;  %v785_v4 = vpack.c.bf16 %v697_v2, %v220_v3 }
  0xf9   :  { %712 = vmatprep.mubr.f32.mxu0 %v145_v1 }
  0xfa   :  { %v700_v8 = vpop.f32.mrb[2].mxu1  ;;  %786 = vmatprep.subr.bf16.mxu1 %v785_v4 }
  0xfb   :  { %v149_v5 = vpop.f32.mrb[6].mxu0  ;;  %v230_v9 = vpop.f32.mrb[3].mxu1 }
  0xfc   :  { %v781_v6 = vpack.c.bf16 %v149_v5, %v143_v0  ;;  %v151_v7 = vpop.f32.mrb[7].mxu0  ;;  %v988_v10 = vpack.c.bf16 %v700_v8, %v230_v9 }
  0xfe   :  { %706 = vmatmul.mubr.f32.vlgmr.msra.gmra.mrb[4].mxu1 %v139_v63  ;;  %782 = vmatprep.subr.bf16.mxu0 %v781_v6 }
  0xff   :  { %784 = vmatpush3.bf16.xpose.msra.mxu0 %v781_v6  ;;  %788 = vmatpush3.bf16.msra.mxu1 %v785_v4 }
 0x100   :  { %790 = vmatprep.subr.bf16.mxu1 %v988_v10 }
 0x106   :  { %713 = vmatmul.mubr.f32.vlgmr.msra.gmra.mrb[8].mxu0 %v151_v7 }
 0x1d1   :  { %v707_v15 = vpop.f32.mrb[4].mxu1 }
 0x1d2   :  { %v305_v16 = vpop.f32.mrb[5].mxu1  ;;  %v397_v19 = vsel %vm395_vm3, %v707_v15, -1e+30 }
 0x1d3   :  { %v396_v17 = vsel %vm394_vm1, %v305_v16, -1e+30  ;;  %v404_v20 = vsel %vm400_vm2, %v397_v19, -inf }
 0x1d4   :  { %v401_v18 = vsel %vm400_vm2, %v396_v17, -inf }
 0x1d5   :  { %402 = vmax.xlane.f32.xlu0 %v401_v18 }
 0x1d9   :  { %405 = vmax.xlane.f32.xlu0 %v404_v20  ;;  %v714_v21 = vpop.f32.mrb[8].mxu0 }
 0x1da   :  { %v380_v22 = vpop.f32.mrb[9].mxu0  ;;  %v399_v25 = vsel %vm395_vm3, %v714_v21, -1e+30 }
 0x1db   :  { %v398_v23 = vsel %vm394_vm1, %v380_v22, -1e+30  ;;  %v410_v26 = vsel %vm400_vm2, %v399_v25, -inf }
 0x1dc   :  { %v407_v24 = vsel %vm400_vm2, %v398_v23, -inf }
 0x1dd   :  { %408 = vmax.xlane.f32.xlu1 %v407_v24 }
 0x1e1   :  { %411 = vmax.xlane.f32.xlu1 %v410_v26 }
 0x262   :  { %v403_v27 = vpop.xlane.xlu0 %402 }
 0x263   :  { %v413_v28 = vsub.f32 %v396_v17, %v403_v27 }
 0x265   :  { %v417_v29 = vmul.f32 1.442695, %v413_v28 }
 0x266   :  { %v406_v30 = vpop.xlane.xlu0 %405 }
 0x267   :  { %797 = vpow2.f32 %v417_v29  ;;  %v414_v31 = vsub.f32 %v397_v19, %v406_v30 }
 0x269   :  { %v419_v32 = vmul.f32 1.442695, %v414_v31 }
 0x26a   :  { %v409_v33 = vpop.xlane.xlu1 %408 }
 0x26b   :  { %799 = vpow2.f32 %v419_v32  ;;  %v415_v34 = vsub.f32 %v398_v23, %v409_v33 }
 0x26d   :  { %v421_v35 = vmul.f32 1.442695, %v415_v34 }
 0x26e   :  { %v412_v36 = vpop.xlane.xlu1 %411 }
 0x26f   :  { %801 = vpow2.f32 %v421_v35  ;;  %v416_v37 = vsub.f32 %v399_v25, %v412_v36 }
 0x271   :  { %v798_v38 = vpop.eup %797  ;;  %v423_v39 = vmul.f32 1.442695, %v416_v37 }
 0x272   :  { %v425_v40 = vsel %vm400_vm2, %v798_v38, 0.0 }
 0x273   :  { %803 = vpow2.f32 %v423_v39  ;;  %426 = vadd.xlane.f32.xlu0 %v425_v40 }
 0x275   :  { %v800_v41 = vpop.eup %799 }
 0x276   :  { %v428_v42 = vsel %vm400_vm2, %v800_v41, 0.0 }
 0x277   :  { %429 = vadd.xlane.f32.xlu1 %v428_v42 }
 0x279   :  { %v802_v43 = vpop.eup %801 }
 0x27a   :  { %v431_v44 = vsel %vm400_vm2, %v802_v43, 0.0 }
 0x27b   :  { %432 = vadd.xlane.f32.xlu0 %v431_v44 }
 0x27d   :  { %v804_v45 = vpop.eup %803 }
 0x27e   :  { %v434_v46 = vsel %vm400_vm2, %v804_v45, 0.0 }
 0x27f   :  { %435 = vadd.xlane.f32.xlu1 %v434_v46 }
 0x300   :  { %v427_v47 = vpop.xlane.xlu0 %426 }
 0x301   :  { %805 = vrcp.f32 %v427_v47 }
 0x304   :  { %v430_v48 = vpop.xlane.xlu1 %429 }
 0x305   :  { %807 = vrcp.f32 %v430_v48 }
 0x308   :  { %v433_v49 = vpop.xlane.xlu0 %432 }
 0x309   :  { %809 = vrcp.f32 %v433_v49 }
 0x30b   :  { %v806_v50 = vpop.eup %805 }
 0x30c   :  { %v436_v51 = vpop.xlane.xlu1 %435  ;;  %v441_v52 = vmul.f32 %v806_v50, %v798_v38 }
 0x30d   :  { %811 = vrcp.f32 %v436_v51 }
 0x30e   :  { %719 = vmatprep.mubr.msk.f32.mxu1 %vm400_vm2, %v441_v52 }
 0x30f   :  { %v808_v53 = vpop.eup %807 }
 0x310   :  { %v442_v54 = vmul.f32 %v808_v53, %v800_v41 }
 0x312   :  { %720 = vmatmul.mubr.msk.f32.vlgmr.msra.gmra.mrb[6].mxu1 %vm400_vm2, %v442_v54 }
 0x313   :  { %v810_v55 = vpop.eup %809  ;;  %792 = vmatpush3.bf16.msra.mxu1 %v988_v10 }
 0x314   :  { %v443_v56 = vmul.f32 %v810_v55, %v802_v43 }
 0x316   :  { %726 = vmatprep.mubr.msk.f32.mxu1 %vm400_vm2, %v443_v56 }
 0x317   :  { %v812_v57 = vpop.eup %811 }
 0x318   :  { %v444_v58 = vmul.f32 %v812_v57, %v804_v45 }
 0x31a   :  { %727 = vmatmul.mubr.msk.f32.vlgmr.msra.gmra.mrb[8].mxu1 %vm400_vm2, %v444_v58 }
 0x3e5   :  { %v721_v59 = vpop.f32.mrb[6].mxu1 }
 0x3e6   :  { %608 = vst [vmem:[#allocation2 + $0x8] sm:$0xff] %v721_v59  ;;  %v517_v60 = vpop.f32.mrb[7].mxu1 }
 0x3e7   :  { %607 = vst [vmem:[#allocation2] sm:$0xff] %v517_v60 }
 0x3ed   :  { %v728_v61 = vpop.f32.mrb[8].mxu1 }
 0x3ee   :  { %610 = vst [vmem:[#allocation2 + $0x18] sm:$0xff] %v728_v61  ;;  %v598_v62 = vpop.f32.mrb[9].mxu1 }
 0x3ef   :  { %609 = vst [vmem:[#allocation2 + $0x10] sm:$0xff] %v598_v62 }
 0x3f0   :  { %824 = shalt.err (!%p821_p4)
}
 0x3f1   :  { %s825_s8 = scalar_lea.hbm %s1018_s2, 512 }
 0x3f2   :  { %p826_p5 = scmp.ne.s32.totalorder %s1018_s2, %s825_s8  ;;  %p829_p6 = scmp.lt.u32.totalorder %s825_s8, %s1018_s2 }
 0x3f4   :  { %p831_p7 = pnand %p829_p6, %p826_p5 }
 0x3f6   :  { %834 = shalt.err (!%p831_p7)
}
 0x3f7   :  { %s839_s13 = smov 128   ;;  %s840_s14 = smov 8  }
 0x3f8   :  { %622 = dma.vmem_to_hbm [thread:$0]  %s617_s4, 512, %s1018_s2, [#allocation3], %s839_s13, %s839_s13, %s840_s14  }
 0x3f9   :  { %835 = dma.done.wait [#allocation3], 512  }
 0x3fa   :  { %836 = vsyncadd [#allocation3], 4294966784 }
 0x3fb   :  { %626 = vsyncpa [#allocation3], 1 }

</bundles_post_ra>
